<compile_context>
chip_gen: v7x
topology: tpu7x:2x2x1
jax: 0.10.0
libtpu: 0.0.40
codegen_flags: <defaults>
</compile_context>

<pallas_src>
import jax
import jax.numpy as jnp
import numpy as np
from jax.experimental import pallas as pl
from jax.experimental.pallas import tpu as pltpu

INPUT_SIZE = 4
HIDDEN_SIZE = 4
NUM_LAYERS = 3
SEQ_LEN = 1
BATCH = 1

G3 = 3 * HIDDEN_SIZE                     # 12 gate lanes per path (r, z, n)
SLAB_LANES = (NUM_LAYERS + 1) * G3       # 48 lanes: [ih0 | hh0 | hh1 | hh2]
SLAB_ROWS = 8 * NUM_LAYERS               # 24 rows, each weight block 8-aligned


def gru_kernel(params_ref, state_ref, out_ref):
    """Single-timestep, 3-layer GRU.

    params_ref : (24, 48)  rows 0-3  : Wcat = [Wih0^T | Whh0^T | Whh1^T | Whh2^T]
                           rows 4-7  : bias matrix B for the entry dot
                                       (row4=b_ih0 @ lanes 0:12, row5=b_hh0 @ 12:24,
                                        row6=b_hh1 @ 24:36,      row7=b_hh2 @ 36:48)
                           rows 8-11 : Wih1^T (lanes 0:12), row 12: b_ih1
                           rows 16-19: Wih2^T (lanes 0:12), row 20: b_ih2
    state_ref  : (4, 4)    row 0 = x, rows 1..3 = h0 per layer
    out_ref    : (3, 4)    new hidden per layer (row 2 is also the GRU output)
    """
    H = HIDDEN_SIZE
    state = state_ref[...]                                   # (4, 4)

    # One MXU pass at entry: G[0,0:12]=gi0+b_ih0, G[l+1,12(l+1):12(l+2)]=gh_l+b_hh_l.
    # All recurrent pre-activations come off the serial layer chain.
    G = jnp.dot(state, params_ref[0:4, :],
                preferred_element_type=jnp.float32) + params_ref[4:8, :]  # (4, 48)

    gi = G[0:1, 0:G3]                                        # layer-0 input path
    for layer in range(NUM_LAYERS):                          # static unroll
        gh = G[layer + 1:layer + 2, G3 * (layer + 1):G3 * (layer + 2)]  # (1, 12)
        h_old = state[layer + 1:layer + 2, :]                # (1, 4)

        # One sigmoid for both r and z (8 adjacent lanes -> single EUP call).
        rz = jax.nn.sigmoid(gi[:, 0:2 * H] + gh[:, 0:2 * H])
        r = rz[:, 0:H]
        z = rz[:, H:2 * H]
        n = jnp.tanh(gi[:, 2 * H:3 * H] + r * gh[:, 2 * H:3 * H])
        h_new = n + z * (h_old - n)                          # == (1-z)*n + z*h_old

        # Store each row as soon as it is ready (idle store slot, no tail concat).
        out_ref[layer:layer + 1, :] = h_new

        if layer + 1 < NUM_LAYERS:
            base = 8 * (layer + 1)                           # 8-sublane-aligned block
            wih = params_ref[base:base + H, 0:G3]            # (4, 12)
            bih = params_ref[base + H:base + H + 1, 0:G3]    # (1, 12)
            # TODO(synk): benchmark a VPU formulation of this (1,4)@(4,12) dot
            # (sublane-broadcast h_new + 4 vmul/vadd) vs. the MXU push/pop latency.
            gi = jnp.dot(h_new, wih, preferred_element_type=jnp.float32) + bih


def pack_params(w_ih, w_hh, b_ih, b_hh):
    """One-time host-side packing of GRU weights into a single (24, 48) slab."""
    H = HIDDEN_SIZE
    slab = np.zeros((SLAB_ROWS, SLAB_LANES), np.float32)
    # Rows 0-3: Wcat = [Wih0^T | Whh0^T | Whh1^T | Whh2^T]
    slab[0:H, 0:G3] = np.asarray(w_ih[0], np.float32).T
    for l in range(NUM_LAYERS):
        slab[0:H, G3 * (l + 1):G3 * (l + 2)] = np.asarray(w_hh[l], np.float32).T
    # Rows 4-7: bias matrix for the entry dot (row i added to G row i).
    slab[4, 0:G3] = np.asarray(b_ih[0], np.float32)
    for l in range(NUM_LAYERS):
        slab[5 + l, G3 * (l + 1):G3 * (l + 2)] = np.asarray(b_hh[l], np.float32)
    # Layers 1..2 input-path weights, each block starting on an 8-row boundary.
    for l in (1, 2):
        base = 8 * l
        slab[base:base + H, 0:G3] = np.asarray(w_ih[l], np.float32).T
        slab[base + H, 0:G3] = np.asarray(b_ih[l], np.float32)
    return jnp.asarray(slab)


def _gru_forward(params_packed, hidden, x):
    """Matches Model.forward(hidden, x) -> (hidden, out)."""
    # x.view(1, seq_len, input_size) with seq_len == 1 -> (1, 4)
    x2d = x.reshape(BATCH, INPUT_SIZE).astype(jnp.float32)
    h2d = hidden.reshape(NUM_LAYERS, HIDDEN_SIZE).astype(jnp.float32)
    state = jnp.concatenate([x2d, h2d], axis=0)               # (4, 4)

    new_h = pl.pallas_call(
        gru_kernel,
        out_shape=jax.ShapeDtypeStruct((NUM_LAYERS, HIDDEN_SIZE), jnp.float32),
        in_specs=[pl.BlockSpec(memory_space=pltpu.MemorySpace.VMEM)] * 2,
        out_specs=pl.BlockSpec(memory_space=pltpu.MemorySpace.VMEM),
    )(params_packed, state)

    hidden_out = new_h.reshape(NUM_LAYERS, BATCH, HIDDEN_SIZE)
    out = new_h[NUM_LAYERS - 1:NUM_LAYERS]                    # top-layer h == out
    return hidden_out, out.reshape(-1, INPUT_SIZE)


gru_forward = jax.jit(_gru_forward)

# TODO(synk): if this GRU is ever run with seq_len > 1 (per-token generation) or a
# real batch, amortize launch + param DMA: move the timestep loop inside the kernel
# (lax.fori_loop with the ~12 KB param slab resident in VMEM and the state carried
# in VMEM scratch), and expose batch as a leading "parallel" grid axis so v7x's
# second TensorCore is used.  At seq_len=1/batch=1 the kernel is dispatch-bound.


def gru_reference(hidden, x, w_ih, w_hh, b_ih, b_hh):
    """Pure-JAX reference implementing PyTorch nn.GRU (single timestep)."""
    inp = x.reshape(BATCH, INPUT_SIZE)
    H = HIDDEN_SIZE
    h_out = []
    for layer in range(NUM_LAYERS):
        h = hidden[layer]
        gi = inp @ w_ih[layer].T + b_ih[layer]
        gh = h @ w_hh[layer].T + b_hh[layer]
        i_r, i_z, i_n = gi[:, 0:H], gi[:, H:2 * H], gi[:, 2 * H:3 * H]
        h_r, h_z, h_n = gh[:, 0:H], gh[:, H:2 * H], gh[:, 2 * H:3 * H]
        r = jax.nn.sigmoid(i_r + h_r)
        z = jax.nn.sigmoid(i_z + h_z)
        n = jnp.tanh(i_n + r * h_n)
        h_new = (1.0 - z) * n + z * h
        h_out.append(h_new)
        inp = h_new
    return jnp.stack(h_out, axis=0), inp.reshape(-1, INPUT_SIZE)


if __name__ == "__main__":
    key = jax.random.PRNGKey(0)
    k_x, k_wih, k_whh, k_bih, k_bhh = jax.random.split(key, 5)

    # Deterministic synthetic parameters (PyTorch GRU init: U(-1/sqrt(H), 1/sqrt(H))).
    bound = 1.0 / np.sqrt(HIDDEN_SIZE)
    w_ih = jax.random.uniform(k_wih, (NUM_LAYERS, 3 * HIDDEN_SIZE, INPUT_SIZE),
                              jnp.float32, -bound, bound)
    w_hh = jax.random.uniform(k_whh, (NUM_LAYERS, 3 * HIDDEN_SIZE, HIDDEN_SIZE),
                              jnp.float32, -bound, bound)
    b_ih = jax.random.uniform(k_bih, (NUM_LAYERS, 3 * HIDDEN_SIZE),
                              jnp.float32, -bound, bound)
    b_hh = jax.random.uniform(k_bhh, (NUM_LAYERS, 3 * HIDDEN_SIZE),
                              jnp.float32, -bound, bound)

    # One-time weight packing (hoisted out of the per-call path).
    params_packed = pack_params(w_ih, w_hh, b_ih, b_hh)
    jax.block_until_ready(params_packed)

    # model.init_hidden() -> zeros(num_layers, 1, hidden_size)
    hidden0 = jnp.zeros((NUM_LAYERS, BATCH, HIDDEN_SIZE), jnp.float32)
    # Input consistent with x.view(1, sequence_length, input_size)
    x = jax.random.normal(k_x, (BATCH, SEQ_LEN, INPUT_SIZE), jnp.float32)

    hidden_out, out = gru_forward(params_packed, hidden0, x)
    jax.block_until_ready(hidden_out)
    jax.block_until_ready(out)

    hidden_ref, out_ref = gru_reference(hidden0, x, w_ih, w_hh, b_ih, b_hh)
    np.testing.assert_allclose(np.asarray(hidden_out), np.asarray(hidden_ref),
                               rtol=1e-5, atol=1e-5)
    np.testing.assert_allclose(np.asarray(out), np.asarray(out_ref),
                               rtol=1e-5, atol=1e-5)

    # Also exercise a second step with non-zero hidden state (recurrent path).
    hidden_out2, out2 = gru_forward(params_packed, hidden_out, x)
    jax.block_until_ready(out2)
    hidden_ref2, out_ref2 = gru_reference(hidden_ref, x, w_ih, w_hh, b_ih, b_hh)
    np.testing.assert_allclose(np.asarray(hidden_out2), np.asarray(hidden_ref2),
                               rtol=1e-5, atol=1e-5)
    np.testing.assert_allclose(np.asarray(out2), np.asarray(out_ref2),
                               rtol=1e-5, atol=1e-5)

    assert hidden_out.shape == (NUM_LAYERS, BATCH, HIDDEN_SIZE)
    assert out.shape == (SEQ_LEN * BATCH, INPUT_SIZE)
    print("KERNEL_OK")
</pallas_src>

<mosaic_0001>
module attributes {stable_mosaic.version = 11 : i64} {
  func.func @gru_kernel(%arg0: memref<24x48xf32, #tpu.memory_space<vmem>>, %arg1: memref<4x4xf32, #tpu.memory_space<vmem>>, %arg2: memref<3x4xf32, #tpu.memory_space<vmem>>) attributes {dimension_semantics = [], scalar_prefetch = 0 : i64, scratch_operands = 0 : i64, tpu.core_type = #tpu.core_type<tc>} {
    %c0 = arith.constant 0 : index
    %c0_0 = arith.constant 0 : index
    %0 = vector.load %arg1[%c0, %c0_0] : memref<4x4xf32, #tpu.memory_space<vmem>>, vector<4x4xf32>
    %c0_1 = arith.constant 0 : index
    %c0_2 = arith.constant 0 : index
    %1 = vector.load %arg0[%c0_1, %c0_2] : memref<24x48xf32, #tpu.memory_space<vmem>>, vector<4x48xf32>
    %cst = arith.constant dense<0.000000e+00> : vector<4x48xf32>
    %2 = tpu.matmul %0, %1, %cst {dimension_numbers = #tpu.dot_dimension_numbers<[1], [0], [0], [1], [0, 0, 1, 1], [], []>} : vector<4x4xf32>, vector<4x48xf32>, vector<4x48xf32> -> vector<4x48xf32>
    %c4 = arith.constant 4 : index
    %c0_3 = arith.constant 0 : index
    %3 = vector.load %arg0[%c4, %c0_3] : memref<24x48xf32, #tpu.memory_space<vmem>>, vector<4x48xf32>
    %4 = arith.addf %2, %3 : vector<4x48xf32>
    %5 = vector.extract_strided_slice %4 {offsets = [0, 0], sizes = [1, 12], strides = [1, 1]} : vector<4x48xf32> to vector<1x12xf32>
    %6 = vector.extract_strided_slice %4 {offsets = [1, 12], sizes = [1, 12], strides = [1, 1]} : vector<4x48xf32> to vector<1x12xf32>
    %7 = vector.extract_strided_slice %0 {offsets = [1, 0], sizes = [1, 4], strides = [1, 1]} : vector<4x4xf32> to vector<1x4xf32>
    %8 = vector.extract_strided_slice %5 {offsets = [0, 0], sizes = [1, 8], strides = [1, 1]} : vector<1x12xf32> to vector<1x8xf32>
    %9 = vector.extract_strided_slice %6 {offsets = [0, 0], sizes = [1, 8], strides = [1, 1]} : vector<1x12xf32> to vector<1x8xf32>
    %10 = arith.addf %8, %9 : vector<1x8xf32>
    %11 = arith.negf %10 : vector<1x8xf32>
    %12 = math.exp %11 : vector<1x8xf32>
    %cst_4 = arith.constant 1.000000e+00 : f32
    %13 = vector.broadcast %cst_4 : f32 to vector<1x8xf32>
    %14 = arith.addf %13, %12 : vector<1x8xf32>
    %15 = arith.divf %13, %14 : vector<1x8xf32>
    %16 = vector.extract_strided_slice %15 {offsets = [0, 0], sizes = [1, 4], strides = [1, 1]} : vector<1x8xf32> to vector<1x4xf32>
    %17 = vector.extract_strided_slice %15 {offsets = [0, 4], sizes = [1, 4], strides = [1, 1]} : vector<1x8xf32> to vector<1x4xf32>
    %18 = vector.extract_strided_slice %5 {offsets = [0, 8], sizes = [1, 4], strides = [1, 1]} : vector<1x12xf32> to vector<1x4xf32>
    %19 = vector.extract_strided_slice %6 {offsets = [0, 8], sizes = [1, 4], strides = [1, 1]} : vector<1x12xf32> to vector<1x4xf32>
    %20 = arith.mulf %16, %19 : vector<1x4xf32>
    %21 = arith.addf %18, %20 : vector<1x4xf32>
    %22 = math.tanh %21 : vector<1x4xf32>
    %23 = arith.subf %7, %22 : vector<1x4xf32>
    %24 = arith.mulf %17, %23 : vector<1x4xf32>
    %25 = arith.addf %22, %24 : vector<1x4xf32>
    %c0_5 = arith.constant 0 : index
    %c0_6 = arith.constant 0 : index
    %26 = vector.load %arg2[%c0_5, %c0_6] : memref<3x4xf32, #tpu.memory_space<vmem>>, vector<1x4xf32>
    tpu.vector_store %arg2[%c0_5, %c0_6], %25 {strides = array<i32>} : memref<3x4xf32, #tpu.memory_space<vmem>>, vector<1x4xf32>,
    %c8 = arith.constant 8 : index
    %c0_7 = arith.constant 0 : index
    %27 = vector.load %arg0[%c8, %c0_7] : memref<24x48xf32, #tpu.memory_space<vmem>>, vector<4x12xf32>
    %c12 = arith.constant 12 : index
    %c0_8 = arith.constant 0 : index
    %28 = vector.load %arg0[%c12, %c0_8] : memref<24x48xf32, #tpu.memory_space<vmem>>, vector<1x12xf32>
    %cst_9 = arith.constant dense<0.000000e+00> : vector<1x12xf32>
    %29 = tpu.matmul %25, %27, %cst_9 {dimension_numbers = #tpu.dot_dimension_numbers<[1], [0], [0], [1], [0, 0, 1, 1], [], []>} : vector<1x4xf32>, vector<4x12xf32>, vector<1x12xf32> -> vector<1x12xf32>
    %30 = arith.addf %29, %28 : vector<1x12xf32>
    %31 = vector.extract_strided_slice %4 {offsets = [2, 24], sizes = [1, 12], strides = [1, 1]} : vector<4x48xf32> to vector<1x12xf32>
    %32 = vector.extract_strided_slice %0 {offsets = [2, 0], sizes = [1, 4], strides = [1, 1]} : vector<4x4xf32> to vector<1x4xf32>
    %33 = vector.extract_strided_slice %30 {offsets = [0, 0], sizes = [1, 8], strides = [1, 1]} : vector<1x12xf32> to vector<1x8xf32>
    %34 = vector.extract_strided_slice %31 {offsets = [0, 0], sizes = [1, 8], strides = [1, 1]} : vector<1x12xf32> to vector<1x8xf32>
    %35 = arith.addf %33, %34 : vector<1x8xf32>
    %36 = arith.negf %35 : vector<1x8xf32>
    %37 = math.exp %36 : vector<1x8xf32>
    %cst_10 = arith.constant 1.000000e+00 : f32
    %38 = vector.broadcast %cst_10 : f32 to vector<1x8xf32>
    %39 = arith.addf %38, %37 : vector<1x8xf32>
    %40 = arith.divf %38, %39 : vector<1x8xf32>
    %41 = vector.extract_strided_slice %40 {offsets = [0, 0], sizes = [1, 4], strides = [1, 1]} : vector<1x8xf32> to vector<1x4xf32>
    %42 = vector.extract_strided_slice %40 {offsets = [0, 4], sizes = [1, 4], strides = [1, 1]} : vector<1x8xf32> to vector<1x4xf32>
    %43 = vector.extract_strided_slice %30 {offsets = [0, 8], sizes = [1, 4], strides = [1, 1]} : vector<1x12xf32> to vector<1x4xf32>
    %44 = vector.extract_strided_slice %31 {offsets = [0, 8], sizes = [1, 4], strides = [1, 1]} : vector<1x12xf32> to vector<1x4xf32>
    %45 = arith.mulf %41, %44 : vector<1x4xf32>
    %46 = arith.addf %43, %45 : vector<1x4xf32>
    %47 = math.tanh %46 : vector<1x4xf32>
    %48 = arith.subf %32, %47 : vector<1x4xf32>
    %49 = arith.mulf %42, %48 : vector<1x4xf32>
    %50 = arith.addf %47, %49 : vector<1x4xf32>
    %c1 = arith.constant 1 : index
    %c0_11 = arith.constant 0 : index
    %51 = vector.load %arg2[%c1, %c0_11] : memref<3x4xf32, #tpu.memory_space<vmem>>, vector<1x4xf32>
    tpu.vector_store %arg2[%c1, %c0_11], %50 {strides = array<i32>} : memref<3x4xf32, #tpu.memory_space<vmem>>, vector<1x4xf32>,
    %c16 = arith.constant 16 : index
    %c0_12 = arith.constant 0 : index
    %52 = vector.load %arg0[%c16, %c0_12] : memref<24x48xf32, #tpu.memory_space<vmem>>, vector<4x12xf32>
    %c20 = arith.constant 20 : index
    %c0_13 = arith.constant 0 : index
    %53 = vector.load %arg0[%c20, %c0_13] : memref<24x48xf32, #tpu.memory_space<vmem>>, vector<1x12xf32>
    %cst_14 = arith.constant dense<0.000000e+00> : vector<1x12xf32>
    %54 = tpu.matmul %50, %52, %cst_14 {dimension_numbers = #tpu.dot_dimension_numbers<[1], [0], [0], [1], [0, 0, 1, 1], [], []>} : vector<1x4xf32>, vector<4x12xf32>, vector<1x12xf32> -> vector<1x12xf32>
    %55 = arith.addf %54, %53 : vector<1x12xf32>
    %56 = vector.extract_strided_slice %4 {offsets = [3, 36], sizes = [1, 12], strides = [1, 1]} : vector<4x48xf32> to vector<1x12xf32>
    %57 = vector.extract_strided_slice %0 {offsets = [3, 0], sizes = [1, 4], strides = [1, 1]} : vector<4x4xf32> to vector<1x4xf32>
    %58 = vector.extract_strided_slice %55 {offsets = [0, 0], sizes = [1, 8], strides = [1, 1]} : vector<1x12xf32> to vector<1x8xf32>
    %59 = vector.extract_strided_slice %56 {offsets = [0, 0], sizes = [1, 8], strides = [1, 1]} : vector<1x12xf32> to vector<1x8xf32>
    %60 = arith.addf %58, %59 : vector<1x8xf32>
    %61 = arith.negf %60 : vector<1x8xf32>
    %62 = math.exp %61 : vector<1x8xf32>
    %cst_15 = arith.constant 1.000000e+00 : f32
    %63 = vector.broadcast %cst_15 : f32 to vector<1x8xf32>
    %64 = arith.addf %63, %62 : vector<1x8xf32>
    %65 = arith.divf %63, %64 : vector<1x8xf32>
    %66 = vector.extract_strided_slice %65 {offsets = [0, 0], sizes = [1, 4], strides = [1, 1]} : vector<1x8xf32> to vector<1x4xf32>
    %67 = vector.extract_strided_slice %65 {offsets = [0, 4], sizes = [1, 4], strides = [1, 1]} : vector<1x8xf32> to vector<1x4xf32>
    %68 = vector.extract_strided_slice %55 {offsets = [0, 8], sizes = [1, 4], strides = [1, 1]} : vector<1x12xf32> to vector<1x4xf32>
    %69 = vector.extract_strided_slice %56 {offsets = [0, 8], sizes = [1, 4], strides = [1, 1]} : vector<1x12xf32> to vector<1x4xf32>
    %70 = arith.mulf %66, %69 : vector<1x4xf32>
    %71 = arith.addf %68, %70 : vector<1x4xf32>
    %72 = math.tanh %71 : vector<1x4xf32>
    %73 = arith.subf %57, %72 : vector<1x4xf32>
    %74 = arith.mulf %67, %73 : vector<1x4xf32>
    %75 = arith.addf %72, %74 : vector<1x4xf32>
    %c2 = arith.constant 2 : index
    %c0_16 = arith.constant 0 : index
    %76 = vector.load %arg2[%c2, %c0_16] : memref<3x4xf32, #tpu.memory_space<vmem>>, vector<1x4xf32>
    tpu.vector_store %arg2[%c2, %c0_16], %75 {strides = array<i32>} : memref<3x4xf32, #tpu.memory_space<vmem>>, vector<1x4xf32>,
    return
  }
}

</mosaic_0001>

<bundles_post_ra>
// kernel: _gru_forward.1
= control target key start
LH: loop header
LB: loop body
LE: loop exit
PB: predicated region body
PF: predicated region fallthrough
CT: control target
= control target key end

     0   :  { %7 = vsyncpa [#allocation3], 0  ;;  %s481_s9 = smov [#allocation2]   ;;  %s571_s0 = inlined_call_operand.hbm [shape: f32[24,48], index: 0, kind: input, shape index: {}]   ;;  %s572_s1 = inlined_call_operand.vmem [shape: f32[4,4], index: 1, kind: input, shape index: {}]   ;;  %s573_s2 = inlined_call_operand.vmem [shape: f32[3,4], index: 2, kind: output, shape index: {}]  }
   0x1   :  { %s13_s10 = sshll.u32 %s481_s9, 4  ;;  %s457_s13 = scalar_lea.hbm %s571_s0, 384  ;;  %s14_s10 = int_to_ptr.vmem [resolvable:$true] %s13_s10 }
   0x2   :  { %p458_p0 = scmp.ne.s32.totalorder %s571_s0, %s457_s13  ;;  %p461_p1 = scmp.lt.u32.totalorder %s457_s13, %s571_s0 }
   0x4   :  { %p463_p2 = pnand %p461_p1, %p458_p0 }
   0x6   :  { %466 = shalt.err (!%p463_p2)
}
   0x7   :  { %s467_s18 = scalar_lea.vmem %s14_s10, 384  ;;  %p472_p4 = scmp.lt.s32.totalorder %s14_s10, %s14_s10 }
   0x8   :  { %p468_p3 = scmp.ne.s32.totalorder %s14_s10, %s467_s18  ;;  %p473_p5 = scmp.lt.s32.totalorder %s467_s18, %s467_s18 }
   0xa   :  { %p474_p6 = por %p473_p5, %p472_p4 }
   0xc   :  { %p475_p7 = pnand %p474_p6, %p468_p3 }
   0xe   :  { %478 = shalt.err (!%p475_p7)
}
   0xf   :  { %s482_s19 = smov 128   ;;  %s483_s20 = smov 8  }
  0x10   :  { %19 = dma.hbm_to_vmem [thread:$0]  %s571_s0, 384, %s14_s10, [#allocation3], %s482_s19, %s482_s19, %s483_s20  }
  0x11   :  { %479 = dma.done.wait [#allocation3], 384  }
  0x12   :  { %480 = vsyncadd [#allocation3], 4294966912  ;;  %v484_v0 = vmov 0.0   ;;  %vm485_vm0 = vmmov 0   ;;  %vm32_vm1 = vcmask 1043456   ;;  %vm28_vm2 = vcmask 31744  }
  0x13   :  { %411 = vmatprep.subr.mxu0 %v484_v0  ;;  %413 = vmatprep.mubr.msk.f32.mxu0 %vm485_vm0, %v484_v0  ;;  %v26_v1 = vld [vmem:[#allocation2] sm:$0xf]  ;;  %v27_v3 = vld [vmem:[#allocation2 + $0x4] sm:$0xf]  ;;  %s486_s0 = smov 116   ;;  %s487_s25 = smov 108  }
  0x14   :  { %416 = vmatprep.subr.mxu1 %v484_v0  ;;  %418 = vmatprep.mubr.msk.f32.mxu1 %vm485_vm0, %v484_v0  ;;  %v525_v2 = vld [vmem:[%s572_s1] sm:$0xf]  ;;  %s488_s1 = smov 120   ;;  %s489_s26 = smov 4   ;;  %v151_v23 = vld [vmem:[#allocation2 + $0x8] sm:$0xf] }
  0x15   :  { %412 = vmatpush3.msk.msra.mxu0 %vm32_vm1, %v26_v1  ;;  %417 = vmatpush3.msk.msra.mxu1 %vm32_vm1, %v151_v23  ;;  %s490_s27 = smov 104   ;;  %s491_s28 = smov 96   ;;  %vm149_vm3 = vcmask 24576   ;;  %v152_v30 = vld [vmem:[#allocation2 + $0xc] sm:$0x1] }
  0x16   :  { %414 = vmatmul.mubr.msk.f32.vlgmr.msra.gmra.mrb[0].mxu0 %vm28_vm2, %v525_v2  ;;  %421 = vmatprep.subr.mxu0 %v484_v0  ;;  %v271_v49 = vld [vmem:[#allocation2 + $0x10] sm:$0xf]  ;;  %s492_s3 = smov 92   ;;  %s493_s4 = smov 84   ;;  %v272_v56 = vld [vmem:[#allocation2 + $0x14] sm:$0x1] }
  0x17   :  { %423 = vmatprep.mubr.msk.f32.mxu0 %vm485_vm0, %v484_v0  ;;  %422 = vmatpush3.msk.msra.mxu0 %vm32_vm1, %v271_v49 }
  0xe9   :  { %v102_v4 = vpop.f32.mrb[0].mxu0 }
  0xea   :  { %v530_v5 = vadd.f32 %v102_v4, %v27_v3  ;;  %v415_v6 = vpop.f32.mrb[1].mxu0 }
  0xec   :  { %v107_v7 = vrot.slane %v530_v5, 1  ;;  %v228_v26 = vrot.slane %v530_v5, 2  ;;  %v348_v52 = vrot.slane %v530_v5, 3 }
  0xee   :  { %108 = vrot.lane.b32.xlu0 %v107_v7, %s486_s0 }
  0xf2   :  { %118 = vrot.lane.b32.xlu0 %v107_v7, %s487_s25 }
 0x160   :  { %v109_v8 = vpop.permute.xlu0 %108 }
 0x161   :  { %v111_v9 = vadd.f32 %v109_v8, %v530_v5 }
 0x163   :  { %v398_v10 = vmul.f32 -1.442695, %v111_v9 }
 0x164   :  { %v119_v14 = vpop.permute.xlu0 %118 }
 0x165   :  { %439 = vpow2.f32 %v398_v10 }
 0x16f   :  { %v440_v11 = vpop.eup %439 }
 0x170   :  { %v115_v12 = vadd.f32 1.0, %v440_v11 }
 0x172   :  { %441 = vrcp.f32 %v115_v12 }
 0x17c   :  { %v442_v13 = vpop.eup %441 }
 0x17d   :  { %v121_v15 = vmul.f32 %v442_v13, %v119_v14 }
 0x17f   :  { %123 = vrot.lane.b32.xlu1 %v121_v15, %s483_s20 }
 0x1f1   :  { %v124_v16 = vpop.permute.xlu1 %123 }
 0x1f2   :  { %v126_v17 = vadd.f32 %v124_v16, %v530_v5 }
 0x1f4   :  { %443 = vtanh.f32 %v126_v17 }
 0x1fe   :  { %v444_v18 = vpop.eup %443 }
 0x1ff   :  { %v129_v19 = vrot.slane %v444_v18, 7 }
 0x201   :  { %130 = vrot.lane.b32.xlu1 %v129_v19, %s488_s1 }
 0x273   :  { %v131_v20 = vpop.permute.xlu1 %130 }
 0x274   :  { %v133_v21 = vsub.f32 %v525_v2, %v131_v20 }
 0x276   :  { %v135_v22 = vrot.slane %v133_v21, 1 }
 0x278   :  { %136 = vrot.lane.b32.xlu0 %v135_v22, %s489_s26 }
 0x2ea   :  { %v137_v24 = vpop.permute.xlu0 %136 }
 0x2eb   :  { %v139_v25 = vmul.f32 %v442_v13, %v137_v24 }
 0x2ed   :  { %141 = vrot.lane.b32.xlu1 %v139_v25, %s489_s26 }
 0x2f1   :  { %229 = vrot.lane.b32.xlu1 %v228_v26, %s490_s27 }
 0x35f   :  { %v142_v27 = vpop.permute.xlu1 %141 }
 0x360   :  { %v144_v28 = vadd.f32 %v444_v18, %v142_v27 }
 0x362   :  { %146 = vrot.lane.b32.xlu0 %v144_v28, %s488_s1 }
 0x363   :  { %v230_v34 = vpop.permute.xlu1 %229 }
 0x366   :  { %239 = vrot.lane.b32.xlu0 %v228_v26, %s491_s28 }
 0x3d4   :  { %v147_v29 = vpop.permute.xlu0 %146 }
 0x3d5   :  { %150 = vst.msk [vmem:[%s573_s2] sm:$0x1] %vm149_vm3, %v147_v29  ;;  %419 = vmatmul.mubr.msk.f32.vlgmr.msra.gmra.mrb[0].mxu1 %vm28_vm2, %v147_v29 }
 0x3d8   :  { %v240_v40 = vpop.permute.xlu0 %239 }
 0x4a8   :  { %v224_v31 = vpop.f32.mrb[0].mxu1 }
 0x4a9   :  { %v225_v32 = vadd.f32 %v224_v31, %v152_v30  ;;  %v420_v33 = vpop.f32.mrb[1].mxu1 }
 0x4ab   :  { %v232_v35 = vadd.f32 %v230_v34, %v225_v32 }
 0x4ad   :  { %v401_v36 = vmul.f32 -1.442695, %v232_v35 }
 0x4af   :  { %445 = vpow2.f32 %v401_v36 }
 0x4b9   :  { %v446_v37 = vpop.eup %445 }
 0x4ba   :  { %v236_v38 = vadd.f32 1.0, %v446_v37 }
 0x4bc   :  { %447 = vrcp.f32 %v236_v38 }
 0x4c6   :  { %v448_v39 = vpop.eup %447 }
 0x4c7   :  { %v242_v41 = vmul.f32 %v448_v39, %v240_v40 }
 0x4c9   :  { %244 = vrot.lane.b32.xlu1 %v242_v41, %s483_s20 }
 0x53b   :  { %v245_v42 = vpop.permute.xlu1 %244 }
 0x53c   :  { %v247_v43 = vadd.f32 %v245_v42, %v225_v32 }
 0x53e   :  { %449 = vtanh.f32 %v247_v43 }
 0x548   :  { %v450_v44 = vpop.eup %449 }
 0x549   :  { %v250_v45 = vrot.slane %v450_v44, 6 }
 0x54b   :  { %251 = vrot.lane.b32.xlu0 %v250_v45, %s488_s1 }
 0x5bd   :  { %v252_v46 = vpop.permute.xlu0 %251 }
 0x5be   :  { %v254_v47 = vsub.f32 %v525_v2, %v252_v46 }
 0x5c0   :  { %v256_v48 = vrot.slane %v254_v47, 2 }
 0x5c2   :  { %257 = vrot.lane.b32.xlu1 %v256_v48, %s489_s26 }
 0x634   :  { %v258_v50 = vpop.permute.xlu1 %257 }
 0x635   :  { %v260_v51 = vmul.f32 %v448_v39, %v258_v50 }
 0x637   :  { %262 = vrot.lane.b32.xlu0 %v260_v51, %s489_s26 }
 0x63b   :  { %349 = vrot.lane.b32.xlu0 %v348_v52, %s492_s3 }
 0x6a9   :  { %v263_v53 = vpop.permute.xlu0 %262 }
 0x6aa   :  { %v265_v54 = vadd.f32 %v450_v44, %v263_v53 }
 0x6ac   :  { %267 = vrot.lane.b32.xlu1 %v265_v54, %s488_s1 }
 0x6ad   :  { %v350_v60 = vpop.permute.xlu0 %349 }
 0x6b0   :  { %359 = vrot.lane.b32.xlu1 %v348_v52, %s493_s4 }
 0x71e   :  { %v268_v55 = vpop.permute.xlu1 %267 }
 0x71f   :  { %270 = vst.msk [vmem:[%s573_s2 + $0x1] sm:$0x1] %vm149_vm3, %v268_v55  ;;  %424 = vmatmul.mubr.msk.f32.vlgmr.msra.gmra.mrb[2].mxu0 %vm28_vm2, %v268_v55 }
 0x722   :  { %v360_v3 = vpop.permute.xlu1 %359 }
 0x7f2   :  { %v344_v57 = vpop.f32.mrb[2].mxu0 }
 0x7f3   :  { %v345_v58 = vadd.f32 %v344_v57, %v272_v56  ;;  %v425_v59 = vpop.f32.mrb[3].mxu0 }
 0x7f5   :  { %v352_v61 = vadd.f32 %v350_v60, %v345_v58 }
 0x7f7   :  { %v404_v62 = vmul.f32 -1.442695, %v352_v61 }
 0x7f9   :  { %451 = vpow2.f32 %v404_v62 }
 0x803   :  { %v452_v63 = vpop.eup %451 }
 0x804   :  { %v356_v0 = vadd.f32 1.0, %v452_v63 }
 0x806   :  { %453 = vrcp.f32 %v356_v0 }
 0x810   :  { %v454_v1 = vpop.eup %453 }
 0x811   :  { %v362_v4 = vmul.f32 %v454_v1, %v360_v3 }
 0x813   :  { %364 = vrot.lane.b32.xlu0 %v362_v4, %s483_s20 }
 0x885   :  { %v365_v5 = vpop.permute.xlu0 %364 }
 0x886   :  { %v367_v6 = vadd.f32 %v365_v5, %v345_v58 }
 0x888   :  { %455 = vtanh.f32 %v367_v6 }
 0x892   :  { %v456_v7 = vpop.eup %455 }
 0x893   :  { %v370_v8 = vrot.slane %v456_v7, 5 }
 0x895   :  { %371 = vrot.lane.b32.xlu1 %v370_v8, %s488_s1 }
 0x907   :  { %v372_v9 = vpop.permute.xlu1 %371 }
 0x908   :  { %v374_v10 = vsub.f32 %v525_v2, %v372_v9 }
 0x90a   :  { %v376_v11 = vrot.slane %v374_v10, 3 }
 0x90c   :  { %377 = vrot.lane.b32.xlu0 %v376_v11, %s489_s26 }
 0x97e   :  { %v378_v12 = vpop.permute.xlu0 %377 }
 0x97f   :  { %v380_v13 = vmul.f32 %v454_v1, %v378_v12 }
 0x981   :  { %382 = vrot.lane.b32.xlu1 %v380_v13, %s489_s26 }
 0x9f3   :  { %v383_v14 = vpop.permute.xlu1 %382 }
 0x9f4   :  { %v385_v15 = vadd.f32 %v456_v7, %v383_v14 }
 0x9f6   :  { %387 = vrot.lane.b32.xlu0 %v385_v15, %s488_s1 }
 0xa68   :  { %v388_v16 = vpop.permute.xlu0 %387 }
 0xa69   :  { %390 = vst.msk [vmem:[%s573_s2 + $0x2] sm:$0x1] %vm149_vm3, %v388_v16 }
 0xa6a   :  { %395 = vsyncpa [#allocation3], 1 }

</bundles_post_ra>
